<compile_context>
chip_gen: v6e
topology: v6e:2x2x1
jax: 0.10.0
libtpu: 0.0.40
codegen_flags: <defaults>
</compile_context>

<pallas_src>
import functools

import jax
import jax.numpy as jnp
import numpy as np
from jax import lax
from jax.experimental import pallas as pl
from jax.experimental.pallas import tpu as pltpu

_HID = 32           # hidden width
_P_ROWS = 2 * _HID  # packed parameter buffer rows (8-aligned)
_CHUNK = 512        # inner sub-chunk width (lanes) processed per fori_loop step

# Packed parameter buffer layout, f32 (64, 32)  [all ref slices 8-sublane aligned]:
#   rows  0:32  per-hidden-unit column vectors ("vecs"), one per lane:
#       col 0 : fc1 weights for input feature 0   (W1^T[:, 0] per hidden unit)
#       col 1 : fc1 weights for input feature 1
#       col 2 : b1
#       col 3 : b2
#       col 4 : fc3 weights (one per hidden unit)
#       col 5 : b3 (scalar, broadcast down the column)
#   rows 32:64  fc2 weights as (out, in) so  h2 = W2_ker @ h1


def mlp_kernel(x_ref, p_ref, o_ref, *, chunk):
    # ---- parameter loads & broadcasts, hoisted out of the chunk loop ----------
    vecs = p_ref[0:_HID, :]                  # (32, 32)
    w2 = p_ref[_HID:2 * _HID, :]             # (32, 32)  [out, in]

    bshape = (_HID, chunk)
    w1c0 = jnp.broadcast_to(vecs[:, 0:1], bshape)   # (32, chunk)
    w1c1 = jnp.broadcast_to(vecs[:, 1:2], bshape)
    b1 = jnp.broadcast_to(vecs[:, 2:3], bshape)
    b2 = jnp.broadcast_to(vecs[:, 3:4], bshape)
    w3c = jnp.broadcast_to(vecs[:, 4:5], bshape)
    b3 = jnp.broadcast_to(vecs[0:1, 5:6], (1, chunk))

    def compute(x):                          # x: (2, chunk), batch on lanes
        x0 = x[0:1, :]                       # (1, chunk) -> sublane broadcast
        x1 = x[1:2, :]
        # fc1 (K=2): VPU broadcast-FMAs, keep it off the MXU.
        h1 = jnp.maximum(w1c0 * x0 + w1c1 * x1 + b1, 0.0)          # (32, chunk)
        # fc2 (32x32): the single MXU matmul.
        h2 = jnp.dot(w2, h1, preferred_element_type=jnp.float32) + b2
        h2 = jnp.maximum(h2, 0.0)                                   # (32, chunk)
        # fc3 (N=1): elementwise multiply + cross-sublane reduce.
        return jnp.sum(h2 * w3c, axis=0, keepdims=True) + b3        # (1, chunk)

    n_chunks = x_ref.shape[1] // chunk       # static at trace time
    if n_chunks == 1:
        o_ref[...] = compute(x_ref[...]).astype(o_ref.dtype)
    else:
        def body(c, carry):
            off = pl.multiple_of(c * chunk, chunk)
            xs = x_ref[:, pl.ds(off, chunk)]
            o_ref[:, pl.ds(off, chunk)] = compute(xs).astype(o_ref.dtype)
            return carry

        lax.fori_loop(0, n_chunks, body, 0)


def _round_up(n, m):
    return ((n + m - 1) // m) * m


@functools.partial(jax.jit, static_argnames=("tile_b",))
def mlp_forward(x, packed_params, *, tile_b=32768):
    """x: (B, 2) f32 -> (B, 1) f32.  packed_params: (64, 32) f32 (see pack_params)."""
    B = x.shape[0]
    tile_b = max(int(tile_b), _CHUNK)

    # ---- batch-in-lanes tiling ------------------------------------------------
    if B <= 2 * _CHUNK:
        # Tiny batch: one grid step, one inner chunk.
        TB = _round_up(B, 128)
        chunk = TB
        Bp = TB
    else:
        Bp = _round_up(B, _CHUNK)
        # >=2 grid steps so both v7x TensorCores get work; more steps for huge B.
        n_steps = max(2, -(-Bp // tile_b))
        TB = _round_up(-(-Bp // n_steps), _CHUNK)
        Bp = _round_up(Bp, TB)
        chunk = _CHUNK

    xt = jnp.transpose(x)                    # (2, B): batch on the lane axis
    if Bp != B:
        xt = jnp.pad(xt, ((0, 0), (0, Bp - B)))

    out = pl.pallas_call(
        functools.partial(mlp_kernel, chunk=chunk),
        out_shape=jax.ShapeDtypeStruct((1, Bp), jnp.float32),
        grid=(Bp // TB,),
        in_specs=[
            pl.BlockSpec((2, TB), lambda i: (0, i)),
            # Constant index_map: the ~8 KiB packed weights stay VMEM-resident.
            pl.BlockSpec((_P_ROWS, _HID), lambda i: (0, 0)),
        ],
        out_specs=pl.BlockSpec((1, TB), lambda i: (0, i)),
        compiler_params=pltpu.CompilerParams(
            dimension_semantics=("parallel",),   # megacore sharding on v7x
        ),
    )(xt, packed_params)
    return out[0, :B].reshape(B, 1)


def init_params(key):
    """Deterministic init mimicking nn.Linear's uniform(-1/sqrt(fan_in), 1/sqrt(fan_in))."""
    ks = jax.random.split(key, 6)

    def linear(kw, kb, fan_in, fan_out):
        bound = 1.0 / np.sqrt(fan_in)
        w = jax.random.uniform(kw, (fan_in, fan_out), jnp.float32, -bound, bound)
        b = jax.random.uniform(kb, (1, fan_out), jnp.float32, -bound, bound)
        return w, b

    w1, b1 = linear(ks[0], ks[1], 2, _HID)
    w2, b2 = linear(ks[2], ks[3], _HID, _HID)
    w3, b3 = linear(ks[4], ks[5], _HID, 1)
    return dict(w1=w1, b1=b1, w2=w2, b2=b2, w3=w3, b3=b3)


def pack_params(p):
    """Pack all weights/biases into one contiguous (64, 32) f32 buffer (transposed layout)."""
    buf = jnp.zeros((_P_ROWS, _HID), jnp.float32)
    buf = buf.at[0:_HID, 0].set(p["w1"][0, :])            # fc1 weights, input feature 0
    buf = buf.at[0:_HID, 1].set(p["w1"][1, :])            # fc1 weights, input feature 1
    buf = buf.at[0:_HID, 2].set(p["b1"].reshape(_HID))
    buf = buf.at[0:_HID, 3].set(p["b2"].reshape(_HID))
    buf = buf.at[0:_HID, 4].set(p["w3"].reshape(_HID))    # fc3 weights as a column
    buf = buf.at[0:_HID, 5].set(p["b3"].reshape(()))      # scalar broadcast
    buf = buf.at[_HID:2 * _HID, :].set(p["w2"].T)         # fc2 weights as (out, in)
    return buf


def mlp_ref(x, p):
    h1 = jnp.maximum(x @ p["w1"] + p["b1"], 0.0)
    h2 = jnp.maximum(h1 @ p["w2"] + p["b2"], 0.0)
    return h2 @ p["w3"] + p["b3"]


if __name__ == "__main__":
    key = jax.random.PRNGKey(0)
    kx, kp = jax.random.split(key)

    params = init_params(kp)
    packed = pack_params(params)

    # Small batch (typical usage): single grid step, single inner chunk.
    B = 8
    x = jax.random.normal(kx, (B, 2), dtype=jnp.float32)
    out = jax.block_until_ready(mlp_forward(x, packed))
    ref = mlp_ref(x, params)
    np.testing.assert_allclose(np.asarray(out), np.asarray(ref), rtol=1e-5, atol=1e-5)
    assert out.shape == (B, 1)

    # Larger, non-multiple batch: exercises >=2 grid steps, inner chunk loop and padding.
    x2 = jax.random.normal(jax.random.PRNGKey(1), (1300, 2), dtype=jnp.float32)
    out2 = jax.block_until_ready(mlp_forward(x2, packed))
    ref2 = mlp_ref(x2, params)
    np.testing.assert_allclose(np.asarray(out2), np.asarray(ref2), rtol=1e-5, atol=1e-5)
    assert out2.shape == (1300, 1)

    print("KERNEL_OK")
</pallas_src>

<mosaic_0001>
module attributes {stable_mosaic.version = 11 : i64} {
  func.func @mlp_kernel(%arg0: i32, %arg1: memref<2x128xf32, #tpu.memory_space<vmem>>, %arg2: memref<64x32xf32, #tpu.memory_space<vmem>>, %arg3: memref<1x128xf32, #tpu.memory_space<vmem>>) attributes {dimension_semantics = [#tpu.dimension_semantics<parallel>], iteration_bounds = array<i64: 1>, scalar_prefetch = 0 : i64, scratch_operands = 0 : i64, tpu.core_type = #tpu.core_type<tc>, window_params = [{transform_indices = @transform_0, window_bounds = array<i64: 2, 128>}, {pipeline_mode = #tpu.pipeline_mode<synchronous>, transform_indices = @transform_1, window_bounds = array<i64: 64, 32>}, {transform_indices = @transform_2, window_bounds = array<i64: 1, 128>}]} {
    %c0 = arith.constant 0 : index
    %c0_0 = arith.constant 0 : index
    %0 = vector.load %arg2[%c0, %c0_0] : memref<64x32xf32, #tpu.memory_space<vmem>>, vector<32x32xf32>
    %c32 = arith.constant 32 : index
    %c0_1 = arith.constant 0 : index
    %1 = vector.load %arg2[%c32, %c0_1] : memref<64x32xf32, #tpu.memory_space<vmem>>, vector<32x32xf32>
    %2 = vector.extract_strided_slice %0 {offsets = [0, 0], sizes = [32, 1], strides = [1, 1]} : vector<32x32xf32> to vector<32x1xf32>
    %3 = vector.shape_cast %2 : vector<32x1xf32> to vector<32x1xf32>
    %4 = vector.broadcast %3 : vector<32x1xf32> to vector<32x128xf32>
    %5 = vector.extract_strided_slice %0 {offsets = [0, 1], sizes = [32, 1], strides = [1, 1]} : vector<32x32xf32> to vector<32x1xf32>
    %6 = vector.shape_cast %5 : vector<32x1xf32> to vector<32x1xf32>
    %7 = vector.broadcast %6 : vector<32x1xf32> to vector<32x128xf32>
    %8 = vector.extract_strided_slice %0 {offsets = [0, 2], sizes = [32, 1], strides = [1, 1]} : vector<32x32xf32> to vector<32x1xf32>
    %9 = vector.shape_cast %8 : vector<32x1xf32> to vector<32x1xf32>
    %10 = vector.broadcast %9 : vector<32x1xf32> to vector<32x128xf32>
    %11 = vector.extract_strided_slice %0 {offsets = [0, 3], sizes = [32, 1], strides = [1, 1]} : vector<32x32xf32> to vector<32x1xf32>
    %12 = vector.shape_cast %11 : vector<32x1xf32> to vector<32x1xf32>
    %13 = vector.broadcast %12 : vector<32x1xf32> to vector<32x128xf32>
    %14 = vector.extract_strided_slice %0 {offsets = [0, 4], sizes = [32, 1], strides = [1, 1]} : vector<32x32xf32> to vector<32x1xf32>
    %15 = vector.shape_cast %14 : vector<32x1xf32> to vector<32x1xf32>
    %16 = vector.broadcast %15 : vector<32x1xf32> to vector<32x128xf32>
    %17 = vector.extract_strided_slice %0 {offsets = [0, 5], sizes = [1, 1], strides = [1, 1]} : vector<32x32xf32> to vector<1x1xf32>
    %18 = vector.shape_cast %17 : vector<1x1xf32> to vector<1x1xf32>
    %19 = vector.broadcast %18 : vector<1x1xf32> to vector<1x128xf32>
    %c0_2 = arith.constant 0 : index
    %c0_3 = arith.constant 0 : index
    %20 = vector.load %arg1[%c0_2, %c0_3] : memref<2x128xf32, #tpu.memory_space<vmem>>, vector<2x128xf32>
    %21 = vector.extract_strided_slice %20 {offsets = [0, 0], sizes = [1, 128], strides = [1, 1]} : vector<2x128xf32> to vector<1x128xf32>
    %22 = vector.extract_strided_slice %20 {offsets = [1, 0], sizes = [1, 128], strides = [1, 1]} : vector<2x128xf32> to vector<1x128xf32>
    %23 = vector.broadcast %21 : vector<1x128xf32> to vector<32x128xf32>
    %24 = arith.mulf %4, %23 : vector<32x128xf32>
    %25 = vector.broadcast %22 : vector<1x128xf32> to vector<32x128xf32>
    %26 = arith.mulf %7, %25 : vector<32x128xf32>
    %27 = arith.addf %24, %26 : vector<32x128xf32>
    %28 = arith.addf %27, %10 : vector<32x128xf32>
    %cst = arith.constant 0.000000e+00 : f32
    %29 = vector.broadcast %cst : f32 to vector<32x128xf32>
    %30 = arith.maximumf %28, %29 : vector<32x128xf32>
    %cst_4 = arith.constant dense<0.000000e+00> : vector<32x128xf32>
    %31 = tpu.matmul %1, %30, %cst_4 {dimension_numbers = #tpu.dot_dimension_numbers<[1], [0], [0], [1], [0, 0, 1, 1], [], []>} : vector<32x32xf32>, vector<32x128xf32>, vector<32x128xf32> -> vector<32x128xf32>
    %32 = arith.addf %31, %13 : vector<32x128xf32>
    %cst_5 = arith.constant 0.000000e+00 : f32
    %33 = vector.broadcast %cst_5 : f32 to vector<32x128xf32>
    %34 = arith.maximumf %32, %33 : vector<32x128xf32>
    %35 = arith.mulf %34, %16 : vector<32x128xf32>
    %cst_6 = arith.constant dense<0.000000e+00> : vector<128xf32>
    %36 = vector.multi_reduction <add>, %35, %cst_6 [0] : vector<32x128xf32> to vector<128xf32>
    %37 = vector.shape_cast %36 : vector<128xf32> to vector<1x128xf32>
    %38 = arith.addf %37, %19 : vector<1x128xf32>
    %c0_7 = arith.constant 0 : index
    %c0_8 = arith.constant 0 : index
    %39 = vector.load %arg3[%c0_7, %c0_8] : memref<1x128xf32, #tpu.memory_space<vmem>>, vector<1x128xf32>
    tpu.vector_store %arg3[%c0_7, %c0_8], %38 {strides = array<i32>} : memref<1x128xf32, #tpu.memory_space<vmem>>, vector<1x128xf32>,
    return
  }
  func.func @transform_0(%arg0: i32) -> (i32, i32) {
    %c0_i32 = arith.constant 0 : i32
    %c0_i32_0 = arith.constant 0 : i32
    return %c0_i32, %arg0 : i32, i32
  }
  func.func @transform_1(%arg0: i32) -> (i32, i32) {
    %c0_i32 = arith.constant 0 : i32
    %c0_i32_0 = arith.constant 0 : i32
    %c0_i32_1 = arith.constant 0 : i32
    return %c0_i32, %c0_i32_0 : i32, i32
  }
  func.func @transform_2(%arg0: i32) -> (i32, i32) {
    %c0_i32 = arith.constant 0 : i32
    %c0_i32_0 = arith.constant 0 : i32
    return %c0_i32, %arg0 : i32, i32
  }
}

</mosaic_0001>

<bundles_post_ra>
// kernel: mlp_forward.1
= control target key start
LH: loop header
LB: loop body
LE: loop exit
PB: predicated region body
PF: predicated region fallthrough
CT: control target
= control target key end

     0   :  { %v312_v0 = vmov 1   ;;  %v313_v1 = vmov 0   ;;  %v314_v6 = vmov 2   ;;  %vm136_vm0 = vcmask 261120   ;;  %s367_s1 = inlined_call_operand.vmem [shape: f32[64,32], index: 1, kind: input, shape index: {}]   ;;  %s368_s0 = inlined_call_operand.vmem [shape: f32[2,128], index: 0, kind: input, shape index: {}]   ;;  %s369_s2 = inlined_call_operand.vmem [shape: f32[1,128], index: 2, kind: output, shape index: {}]  }
   0x1   :  { %297 = vset.pattern.permute.xlu0 %v312_v0  ;;  %298 = vset.pattern.permute.xlu1 %v313_v1  ;;  %v14_v2 = vld [vmem:[%s367_s1 + $0x18] sm:$0xff]  ;;  %v13_v3 = vld [vmem:[%s367_s1 + $0x10] sm:$0xff]  ;;  %v12_v4 = vld [vmem:[%s367_s1 + $0x8] sm:$0xff]  ;;  %v315_v9 = vmov 3   ;;  %v316_v10 = vmov 4   ;;  %v317_v11 = vmov 5   ;;  %v108_v12 = vlaneseq }
   0x2   :  { %52 = vperm.xlu0 %297, %v14_v2   ;;  %31 = vperm.xlu1 %298, %v13_v3   ;;  %v11_v5 = vld [vmem:[%s367_s1] sm:$0xff]  ;;  %v17_v8 = vld [vmem:[%s367_s1 + $0x30] sm:$0xff]  ;;  %v16_v51 = vld [vmem:[%s367_s1 + $0x28] sm:$0xff] }
   0x3   :  { %v15_v7 = vld [vmem:[%s367_s1 + $0x20] sm:$0xff]  ;;  %280 = vmatprep.mubr.msk.f32.mxu1 %vm136_vm0, %v17_v8  ;;  %v109_v13 = vshrl.u32 %v108_v12, 7  ;;  %v18_v52 = vld [vmem:[%s367_s1 + $0x38] sm:$0xff] }
   0x4   :  { %277 = vmatprep.mubr.msk.f32.mxu0 %vm136_vm0, %v15_v7  ;;  %v107_v19 = vld [vmem:[%s368_s0] sm:$0x3] }
   0x5   :  { %v110_v16 = vsub.s32 0, %v109_v13  ;;  %v118_v17 = vsub.s32 1, %v109_v13 }
   0x6   :  { %299 = vset.pattern.permute.xlu1 %v312_v0  ;;  %44 = vperm.xlu0 %297, %v12_v4  }
   0x7   :  { %48 = vperm.xlu1 %299, %v13_v3   ;;  %v111_v21 = vrot.slane %v107_v19, %v110_v16  ;;  %v119_v22 = vrot.slane %v107_v19, %v118_v17 }
   0xa   :  { %301 = vset.pattern.permute.xlu0 %v313_v1 }
   0xb   :  { %300 = vset.pattern.permute.xlu1 %v313_v1  ;;  %36 = vperm.xlu0 %301, %v14_v2  }
   0xc   :  { %26 = vperm.xlu1 %300, %v12_v4  }
   0xf   :  { %21 = vperm.xlu0 %301, %v11_v5  }
  0x10   :  { %302 = vset.pattern.permute.xlu1 %v314_v6 }
  0x11   :  { %68 = vperm.xlu1 %302, %v14_v2  }
  0x13   :  { %305 = vset.pattern.permute.xlu0 %v314_v6 }
  0x14   :  { %60 = vperm.xlu0 %305, %v12_v4  }
  0x15   :  { %303 = vset.pattern.permute.xlu1 %v312_v0 }
  0x16   :  { %40 = vperm.xlu1 %303, %v11_v5  }
  0x18   :  { %307 = vset.pattern.permute.xlu0 %v315_v9 }
  0x19   :  { %76 = vperm.xlu0 %307, %v12_v4  }
  0x1a   :  { %304 = vset.pattern.permute.xlu1 %v314_v6 }
  0x1b   :  { %64 = vperm.xlu1 %304, %v13_v3  }
  0x1d   :  { %308 = vset.pattern.permute.xlu0 %v316_v10 }
  0x1e   :  { %88 = vperm.xlu0 %308, %v11_v5  }
  0x1f   :  { %56 = vperm.xlu1 %304, %v11_v5  }
  0x22   :  { %100 = vperm.xlu0 %308, %v14_v2  }
  0x23   :  { %306 = vset.pattern.permute.xlu1 %v315_v9 }
  0x24   :  { %72 = vperm.xlu1 %306, %v11_v5  }
  0x26   :  { %311 = vset.pattern.permute.xlu0 %v317_v11 }
  0x28   :  { %80 = vperm.xlu1 %306, %v13_v3  }
  0x2c   :  { %84 = vperm.xlu1 %306, %v14_v2  }
  0x30   :  { %309 = vset.pattern.permute.xlu1 %v316_v10 }
  0x31   :  { %92 = vperm.xlu1 %309, %v12_v4  }
  0x35   :  { %96 = vperm.xlu1 %309, %v13_v3  }
  0x39   :  { %310 = vset.pattern.permute.xlu1 %v317_v11 }
  0x3a   :  { %104 = vperm.xlu1 %310, %v11_v5  }
  0x7d   :  { %v32_v14 = vpop.permute.xlu1 %31  ;;  %v53_v15 = vpop.permute.xlu0 %52 }
  0x7e   :  { %v123_v24 = vmul.f32 %v119_v22, %v53_v15  ;;  %v114_v36 = vmul.f32 %v111_v21, %v32_v14 }
  0x81   :  { %v45_v18 = vpop.permute.xlu0 %44 }
  0x82   :  { %v49_v20 = vpop.permute.xlu1 %48  ;;  %v121_v33 = vmul.f32 %v119_v22, %v45_v18 }
  0x83   :  { %v122_v32 = vmul.f32 %v119_v22, %v49_v20 }
  0x85   :  { %v126_v40 = vadd.f32 %v122_v32, %v114_v36 }
  0x86   :  { %v37_v23 = vpop.permute.xlu0 %36 }
  0x87   :  { %v115_v25 = vmul.f32 %v111_v21, %v37_v23  ;;  %v27_v26 = vpop.permute.xlu1 %26 }
  0x88   :  { %v113_v34 = vmul.f32 %v111_v21, %v27_v26 }
  0x89   :  { %v127_v27 = vadd.f32 %v123_v24, %v115_v25 }
  0x8a   :  { %v22_v30 = vpop.permute.xlu0 %21  ;;  %v125_v38 = vadd.f32 %v121_v33, %v113_v34 }
  0x8b   :  { %v112_v42 = vmul.f32 %v111_v21, %v22_v30 }
  0x8c   :  { %v69_v28 = vpop.permute.xlu1 %68 }
  0x8d   :  { %v131_v29 = vadd.f32 %v127_v27, %v69_v28 }
  0x8f   :  { %v135_v31 = vmax.f32 %v131_v29, 0.0  ;;  %v61_v37 = vpop.permute.xlu0 %60 }
  0x90   :  { %v129_v43 = vadd.f32 %v125_v38, %v61_v37 }
  0x91   :  { %v41_v35 = vpop.permute.xlu1 %40  ;;  %269 = vmatprep.subr.mxu0 %v135_v31  ;;  %283 = vmatprep.subr.mxu1 %v135_v31 }
  0x92   :  { %270 = vmatpush3.msra.mxu0 %v135_v31  ;;  %287 = vmatpush3.msra.mxu1 %v135_v31  ;;  %v120_v39 = vmul.f32 %v119_v22, %v41_v35  ;;  %v133_v48 = vmax.f32 %v129_v43, 0.0 }
  0x94   :  { %v124_v46 = vadd.f32 %v120_v39, %v112_v42  ;;  %v77_v55 = vpop.permute.xlu0 %76 }
  0x96   :  { %v65_v41 = vpop.permute.xlu1 %64 }
  0x97   :  { %v130_v44 = vadd.f32 %v126_v40, %v65_v41 }
  0x99   :  { %v134_v45 = vmax.f32 %v130_v44, 0.0  ;;  %v89_v60 = vpop.permute.xlu0 %88 }
  0x9a   :  { %v57_v47 = vpop.permute.xlu1 %56 }
  0x9b   :  { %v128_v49 = vadd.f32 %v124_v46, %v57_v47  ;;  %271 = vmatprep.subr.mxu0 %v134_v45  ;;  %284 = vmatprep.subr.mxu1 %v134_v45 }
  0x9c   :  { %272 = vmatpush3.msra.mxu0 %v134_v45  ;;  %288 = vmatpush3.msra.mxu1 %v134_v45 }
  0x9d   :  { %v132_v50 = vmax.f32 %v128_v49, 0.0  ;;  %273 = vmatprep.subr.mxu0 %v133_v48  ;;  %285 = vmatprep.subr.mxu1 %v133_v48  ;;  %v101_v10 = vpop.permute.xlu0 %100 }
  0x9e   :  { %274 = vmatpush3.msra.mxu0 %v133_v48  ;;  %289 = vmatpush3.msra.mxu1 %v133_v48 }
  0x9f   :  { %275 = vmatprep.subr.mxu0 %v132_v50  ;;  %286 = vmatprep.subr.mxu1 %v132_v50  ;;  %v73_v53 = vpop.permute.xlu1 %72 }
  0xa0   :  { %276 = vmatpush3.msra.mxu0 %v132_v50  ;;  %290 = vmatpush3.msra.mxu1 %v132_v50 }
  0xa1   :  { %278 = vmatmul.mubr.msk.f32.vlgmr.msra.gmra.mxu0 %vm136_vm0, %v16_v51  ;;  %281 = vmatmul.mubr.msk.f32.vlgmr.msra.gmra.mxu1 %vm136_vm0, %v18_v52 }
  0xa3   :  { %v81_v54 = vpop.permute.xlu1 %80 }
  0xa7   :  { %v85_v56 = vpop.permute.xlu1 %84 }
  0xac   :  { %v93_v59 = vpop.permute.xlu1 %92 }
  0xb0   :  { %v97_v9 = vpop.permute.xlu1 %96 }
  0xb5   :  { %v105_v21 = vpop.permute.xlu1 %104 }
 0x161   :  { %v279_v57 = vpop.f32.mrf.mxu0  ;;  %v282_v58 = vpop.f32.mrf.mxu1 }
 0x162   :  { %v221_v61 = vadd.f32 %v279_v57, %v77_v55  ;;  %v231_v1 = vadd.f32 %v282_v58, %v85_v56 }
 0x163   :  { %v215_v62 = vpop.f32.mrf.mxu0  ;;  %v225_v63 = vpop.f32.mrf.mxu1 }
 0x164   :  { %v235_v0 = vmax.f32 %v221_v61, 0.0  ;;  %v216_v2 = vadd.f32 %v215_v62, %v73_v53  ;;  %v226_v3 = vadd.f32 %v225_v63, %v81_v54  ;;  %v237_v7 = vmax.f32 %v231_v1, 0.0 }
 0x166   :  { %v234_v4 = vmax.f32 %v216_v2, 0.0  ;;  %v236_v5 = vmax.f32 %v226_v3, 0.0  ;;  %v239_v6 = vmul.f32 %v235_v0, %v93_v59  ;;  %v241_v14 = vmul.f32 %v237_v7, %v101_v10 }
 0x168   :  { %v238_v8 = vmul.f32 %v234_v4, %v89_v60  ;;  %v240_v11 = vmul.f32 %v236_v5, %v97_v9 }
 0x16a   :  { %v242_v12 = vadd.f32 %v239_v6, %v238_v8 }
 0x16c   :  { %v243_v13 = vadd.f32 %v242_v12, %v240_v11 }
 0x16e   :  { %v244_v15 = vadd.f32 %v243_v13, %v241_v14 }
 0x170   :  { %v245_v16 = vrot.slane %v244_v15, 4 }
 0x172   :  { %v246_v17 = vadd.f32 %v245_v16, %v244_v15 }
 0x174   :  { %v247_v18 = vrot.slane %v246_v17, 2 }
 0x176   :  { %v248_v19 = vadd.f32 %v247_v18, %v246_v17 }
 0x178   :  { %v249_v20 = vrot.slane %v248_v19, 1 }
 0x17a   :  { %v250_v22 = vadd.f32 %v249_v20, %v248_v19 }
 0x17c   :  { %v251_v23 = vadd.f32 %v250_v22, %v105_v21 }
 0x17e   :  { %252 = vst [vmem:[%s369_s2] sm:$0x1] %v251_v23 }

</bundles_post_ra>
